<compile_context>
chip_gen: v7x
topology: tpu7x:2x2x1
jax: 0.10.0
libtpu: 0.0.40
codegen_flags: <defaults>
</compile_context>

<pallas_src>
import functools

import jax
import jax.numpy as jnp
from jax import lax
from jax.experimental import pallas as pl
from jax.experimental.pallas import tpu as pltpu

NBLK = 1024   # default frames per grid step (lane axis); the wrapper may shrink it
_CH = 8       # window rows per autocorrelation chunk (one vreg row-group)


def _round_up(x, m):
    return -(-x // m) * m


def _recip(x):
    """Fast reciprocal: EUP approx + one Newton-Raphson step (~f32-divide accuracy)."""
    y = pl.reciprocal(x, approx=True)
    return y * (2.0 - x * y)


def _lpc_kernel(x_ref, halo_ref, out_ref, xext_ref, *,
                windows, strides, num_code, nblk, kp, wext):
    """Fused framing + circular autocorrelation + sublane-packed Levinson-Durbin.

    x_ref:    [S, nblk]    de-interleaved audio: x[rr, m] = audio[(blk*nblk + m)*S + rr]
    halo_ref: [S, 128]     next 128 columns (covers the frame overlap)
    out_ref:  [kp, nblk]   rows 1..num_code = LPC coefficients (wrapper slices them out)
    xext_ref: [wext, nblk] scratch: frame tile + K wrap rows + zero padding
    """
    W, S, K = windows, strides, num_code
    Q = -(-W // S)                    # ceil(W / S): lane-shifted slices per window
    eps = jnp.float32(1e-7)
    f32 = jnp.float32

    # ---- 1. build the extended frame tile in VMEM scratch (single pass) --------------
    #   rows [0, W)      : X[w, n] = audio[(frame n)*S + w]
    #   rows [W, W+K)    : wrap rows X[0..K-1]  (circular autocorrelation)
    #   rows [W+K, wext) : zeros (only read multiplied by masked A rows)
    for q in range(Q):
        rows = min(S, W - q * S)
        if q == 0:
            val = x_ref[pl.ds(0, rows), :].astype(f32)
        else:
            left = x_ref[pl.ds(0, rows), pl.ds(q, nblk - q)].astype(f32)
            right = halo_ref[pl.ds(0, rows), pl.ds(0, q)].astype(f32)
            val = jnp.concatenate([left, right], axis=-1)
        xext_ref[pl.ds(q * S, rows), :] = val

    xext_ref[pl.ds(W, K), :] = xext_ref[pl.ds(0, K), :]          # wrap rows
    tail = wext - (W + K)
    if tail > 0:
        xext_ref[pl.ds(W + K, tail), :] = jnp.zeros((tail, nblk), f32)

    # ---- 2. circular autocorrelation, register-blocked over 8-row chunks -------------
    n_ch = -(-W // _CH)
    row_iota = lax.broadcasted_iota(jnp.int32, (_CH, nblk), 0)

    def chunk_body(c, accs):
        row0 = pl.multiple_of(c * _CH, _CH)
        blk = xext_ref[pl.ds(row0, _CH + K), :]                   # [CH+K, nblk], loaded once
        a = jnp.where(row_iota < W - c * _CH, blk[:_CH, :], 0.0)  # mask rows >= W
        return tuple(accs[k] + a * blk[k:k + _CH, :] for k in range(K + 1))

    accs = lax.fori_loop(
        0, n_ch, chunk_body,
        tuple(jnp.zeros((_CH, nblk), f32) for _ in range(K + 1)))
    r = [jnp.sum(p, axis=0, keepdims=True) for p in accs]         # (K+1) x [1, nblk]

    # ---- 3. Levinson-Durbin (solve_toeplitz), lag axis packed onto sublanes ----------
    ones = jnp.ones_like(r[0])
    zeros = jnp.zeros_like(r[0])
    s1 = -r[1] * _recip(jnp.maximum(r[0], eps))
    extra = r[0] + r[1] * s1

    # sol[i]   : packed solution rows (row i = coefficient of order i, zeros beyond)
    sol = jnp.concatenate([ones, s1] + [zeros] * (kp - 2), axis=0)        # [kp, nblk]
    if K > 1:
        # solr[i]  = sol_aug[k+1-i] (reversed view, re-aligned by a roll each step)
        solr = jnp.concatenate([zeros, s1, ones] + [zeros] * (kp - 3), axis=0)
        # rr[j]    = r[k+1-j] at step k; initialized cyclically so a roll-by-1 re-aligns it
        rr_rows = []
        for p in range(kp):
            idx = (2 - p) % kp
            rr_rows.append(r[idx] if idx <= K else zeros)
        rr = jnp.concatenate(rr_rows, axis=0)                             # [kp, nblk]

        for k in range(1, K):
            num = jnp.sum(sol * rr, axis=0, keepdims=True)                # [1, nblk]
            lam = -num * _recip(jnp.maximum(extra, eps))
            new_sol = sol + lam * solr
            new_solr = solr + lam * sol
            extra = (1.0 - lam * lam) * extra
            sol = new_sol
            if k < K - 1:
                solr = pltpu.roll(new_solr, shift=1, axis=0)
                rr = pltpu.roll(rr, shift=1, axis=0)

    # ---- 4. lane-dense full-tile store; the wrapper keeps rows 1..K -------------------
    out_ref[...] = sol.astype(out_ref.dtype)


@functools.partial(jax.jit, static_argnames=("num_code", "windows", "strides", "nblk"))
def linear_predictive_coding(inputs, *, num_code, windows, strides, nblk=NBLK):
    """inputs: [B, T] audio. Returns [B, T//strides + 1, num_code] float32."""
    B, T = inputs.shape
    W, S, K = windows, strides, num_code
    assert K >= 1 and W >= K + 1, "need windows >= num_code + 1"
    Q = -(-W // S)
    assert Q <= 128, "windows/strides ratio too large for the 128-lane halo block"

    F = T // S + 1                    # frames per batch (== torch unfold after pad-by-W)

    # ---- choose the lane-block size (frames per grid step) ---------------------------
    nblk = max(128, (nblk // 128) * 128)
    nblk = min(nblk, max(128, _round_up(F, 128)))                   # don't go far past F
    nblk = min(nblk, max(128, (5120 // (K + 1)) // 128 * 128))      # lag-acc vreg budget
    if B == 1 and F > 128:                                          # >=2 steps for v7x's 2 TCs
        nblk = min(nblk, max(128, _round_up(_round_up(F, 2) // 2, 128)))

    n_ch = -(-W // _CH)
    wext = _round_up(n_ch * _CH + K, 8)
    kp = max(8, _round_up(K + 1, 8))
    in_bytes = jnp.dtype(inputs.dtype).itemsize

    def footprint(nb):   # rough per-step VMEM bytes (double-buffered in/out + scratch)
        return wext * nb * 4 + 2 * S * (nb + 128) * in_bytes + 2 * kp * nb * 4

    while nblk > 128 and footprint(nblk) > 12 * 1024 * 1024:
        nblk = max(128, (nblk // 2) // 128 * 128)

    NB = -(-F // nblk)                # frame-blocks per batch
    ncols = NB * nblk + 128           # de-interleaved columns, incl. halo for last block
    LP = ncols * S                    # padded samples per batch (zeros beyond T, as torch)

    # De-interleave raw audio once (keeps the source dtype; kernel casts to f32):
    #   x2t[b, rr, m] = padded_audio[b, m*S + rr]
    xp = jnp.pad(inputs, ((0, 0), (0, LP - T)))
    x2t = jnp.swapaxes(xp.reshape(B, ncols, S), 1, 2)               # [B, S, ncols]

    lanes_per_blk = nblk // 128
    kernel = functools.partial(
        _lpc_kernel, windows=W, strides=S, num_code=K, nblk=nblk, kp=kp, wext=wext)

    out = pl.pallas_call(
        kernel,
        out_shape=jax.ShapeDtypeStruct((B, kp, NB * nblk), jnp.float32),
        grid=(B, NB),
        in_specs=[
            # main slab: nblk columns of the de-interleaved audio for this frame block
            pl.BlockSpec((None, S, nblk), lambda i, b: (i, 0, b)),
            # halo: the next 128 columns (frames overlap by W samples = Q columns)
            pl.BlockSpec((None, S, 128), lambda i, b: (i, 0, (b + 1) * lanes_per_blk)),
        ],
        out_specs=pl.BlockSpec((None, kp, nblk), lambda i, b: (i, 0, b)),
        scratch_shapes=[pltpu.VMEM((wext, nblk), jnp.float32)],
        compiler_params=pltpu.CompilerParams(
            dimension_semantics=("parallel", "parallel")),
    )(x2t, x2t)

    # packed solution rows 1..K are the LPC coefficients: [B, kp, NB*nblk] -> [B, F, K]
    return jnp.swapaxes(out[:, 1:K + 1, :], 1, 2)[:, :F, :]


def _reference(inputs, *, num_code, windows, strides):
    """Pure-JAX reference mirroring the PyTorch module (uses FFT autocorrelation)."""
    w = windows
    xp = jnp.pad(inputs, ((0, 0), (0, w)))
    num_frames = inputs.shape[-1] // strides + 1
    idx = jnp.arange(num_frames)[:, None] * strides + jnp.arange(w)[None, :]
    frames = xp[:, idx]
    fft = jnp.fft.rfft(frames, axis=-1)
    corr = jnp.fft.irfft(jnp.abs(fft) ** 2, axis=-1)[..., : num_code + 1]
    sol = jnp.concatenate(
        [jnp.ones_like(corr[..., :1]),
         (-corr[..., 1] / jnp.maximum(corr[..., 0], 1e-7))[..., None]], axis=-1)
    extra = corr[..., 0] + corr[..., 1] * sol[..., 1]
    for k in range(1, num_code):
        lam = -(sol[..., : k + 1] * jnp.flip(corr[..., 1:k + 2], axis=-1)).sum(-1) \
              / jnp.maximum(extra, 1e-7)
        aug = jnp.pad(sol, ((0, 0), (0, 0), (0, 1)))
        sol = aug + lam[..., None] * jnp.flip(aug, axis=-1)
        extra = (1.0 - lam ** 2) * extra
    return sol[..., 1:]


if __name__ == "__main__":
    key = jax.random.PRNGKey(0)
    B, T = 2, 64
    num_code, windows, strides = 4, 16, 4

    x = jax.random.normal(key, (B, T), dtype=jnp.float32)

    lpc = linear_predictive_coding(x, num_code=num_code, windows=windows, strides=strides)
    jax.block_until_ready(lpc)

    assert lpc.shape == (B, T // strides + 1, num_code), lpc.shape

    ref = _reference(x, num_code=num_code, windows=windows, strides=strides)
    assert jnp.allclose(lpc, ref, atol=1e-4, rtol=1e-4), float(jnp.max(jnp.abs(lpc - ref)))

    print("KERNEL_OK")
</pallas_src>

<mosaic_0001>
module attributes {stable_mosaic.version = 11 : i64} {
  func.func @_lpc_kernel(%arg0: i32, %arg1: i32, %arg2: memref<1x4x128xf32, #tpu.memory_space<vmem>>, %arg3: memref<1x4x128xf32, #tpu.memory_space<vmem>>, %arg4: memref<1x8x128xf32, #tpu.memory_space<vmem>>, %arg5: memref<24x128xf32, #tpu.memory_space<vmem>>) attributes {dimension_semantics = [#tpu.dimension_semantics<parallel>, #tpu.dimension_semantics<parallel>], iteration_bounds = array<i64: 2, 1>, scalar_prefetch = 0 : i64, scratch_operands = 1 : i64, tpu.core_type = #tpu.core_type<tc>, window_params = [{transform_indices = @transform_0, window_bounds = array<i64: 1, 4, 128>}, {transform_indices = @transform_1, window_bounds = array<i64: 1, 4, 128>}, {transform_indices = @transform_2, window_bounds = array<i64: 1, 8, 128>}]} {
    %c0 = arith.constant 0 : index
    %c0_0 = arith.constant 0 : index
    %c0_1 = arith.constant 0 : index
    %0 = vector.load %arg2[%c0, %c0_0, %c0_1] : memref<1x4x128xf32, #tpu.memory_space<vmem>>, vector<1x4x128xf32>
    %1 = vector.shape_cast %0 : vector<1x4x128xf32> to vector<4x128xf32>
    %c0_2 = arith.constant 0 : index
    %c0_3 = arith.constant 0 : index
    %2 = vector.load %arg5[%c0_2, %c0_3] : memref<24x128xf32, #tpu.memory_space<vmem>>, vector<4x128xf32>
    tpu.vector_store %arg5[%c0_2, %c0_3], %1 {strides = array<i32>} : memref<24x128xf32, #tpu.memory_space<vmem>>, vector<4x128xf32>,
    %c0_4 = arith.constant 0 : index
    %c0_5 = arith.constant 0 : index
    %c1 = arith.constant 1 : index
    %3 = vector.load %arg2[%c0_4, %c0_5, %c1] : memref<1x4x128xf32, #tpu.memory_space<vmem>>, vector<1x4x127xf32>
    %4 = vector.shape_cast %3 : vector<1x4x127xf32> to vector<4x127xf32>
    %c0_6 = arith.constant 0 : index
    %c0_7 = arith.constant 0 : index
    %c0_8 = arith.constant 0 : index
    %5 = vector.load %arg3[%c0_6, %c0_7, %c0_8] : memref<1x4x128xf32, #tpu.memory_space<vmem>>, vector<1x4x1xf32>
    %6 = vector.shape_cast %5 : vector<1x4x1xf32> to vector<4x1xf32>
    %7 = tpu.concatenate %4, %6 in 1 : vector<4x127xf32>, vector<4x1xf32> -> vector<4x128xf32>
    %c4 = arith.constant 4 : index
    %c0_9 = arith.constant 0 : index
    %8 = vector.load %arg5[%c4, %c0_9] : memref<24x128xf32, #tpu.memory_space<vmem>>, vector<4x128xf32>
    tpu.vector_store %arg5[%c4, %c0_9], %7 {strides = array<i32>} : memref<24x128xf32, #tpu.memory_space<vmem>>, vector<4x128xf32>,
    %c0_10 = arith.constant 0 : index
    %c0_11 = arith.constant 0 : index
    %c2 = arith.constant 2 : index
    %9 = vector.load %arg2[%c0_10, %c0_11, %c2] : memref<1x4x128xf32, #tpu.memory_space<vmem>>, vector<1x4x126xf32>
    %10 = vector.shape_cast %9 : vector<1x4x126xf32> to vector<4x126xf32>
    %c0_12 = arith.constant 0 : index
    %c0_13 = arith.constant 0 : index
    %c0_14 = arith.constant 0 : index
    %11 = vector.load %arg3[%c0_12, %c0_13, %c0_14] : memref<1x4x128xf32, #tpu.memory_space<vmem>>, vector<1x4x2xf32>
    %12 = vector.shape_cast %11 : vector<1x4x2xf32> to vector<4x2xf32>
    %13 = tpu.concatenate %10, %12 in 1 : vector<4x126xf32>, vector<4x2xf32> -> vector<4x128xf32>
    %c8 = arith.constant 8 : index
    %c0_15 = arith.constant 0 : index
    %14 = vector.load %arg5[%c8, %c0_15] : memref<24x128xf32, #tpu.memory_space<vmem>>, vector<4x128xf32>
    tpu.vector_store %arg5[%c8, %c0_15], %13 {strides = array<i32>} : memref<24x128xf32, #tpu.memory_space<vmem>>, vector<4x128xf32>,
    %c0_16 = arith.constant 0 : index
    %c0_17 = arith.constant 0 : index
    %c3 = arith.constant 3 : index
    %15 = vector.load %arg2[%c0_16, %c0_17, %c3] : memref<1x4x128xf32, #tpu.memory_space<vmem>>, vector<1x4x125xf32>
    %16 = vector.shape_cast %15 : vector<1x4x125xf32> to vector<4x125xf32>
    %c0_18 = arith.constant 0 : index
    %c0_19 = arith.constant 0 : index
    %c0_20 = arith.constant 0 : index
    %17 = vector.load %arg3[%c0_18, %c0_19, %c0_20] : memref<1x4x128xf32, #tpu.memory_space<vmem>>, vector<1x4x3xf32>
    %18 = vector.shape_cast %17 : vector<1x4x3xf32> to vector<4x3xf32>
    %19 = tpu.concatenate %16, %18 in 1 : vector<4x125xf32>, vector<4x3xf32> -> vector<4x128xf32>
    %c12 = arith.constant 12 : index
    %c0_21 = arith.constant 0 : index
    %20 = vector.load %arg5[%c12, %c0_21] : memref<24x128xf32, #tpu.memory_space<vmem>>, vector<4x128xf32>
    tpu.vector_store %arg5[%c12, %c0_21], %19 {strides = array<i32>} : memref<24x128xf32, #tpu.memory_space<vmem>>, vector<4x128xf32>,
    %c0_22 = arith.constant 0 : index
    %c0_23 = arith.constant 0 : index
    %21 = vector.load %arg5[%c0_22, %c0_23] : memref<24x128xf32, #tpu.memory_space<vmem>>, vector<4x128xf32>
    %c16 = arith.constant 16 : index
    %c0_24 = arith.constant 0 : index
    %22 = vector.load %arg5[%c16, %c0_24] : memref<24x128xf32, #tpu.memory_space<vmem>>, vector<4x128xf32>
    tpu.vector_store %arg5[%c16, %c0_24], %21 {strides = array<i32>} : memref<24x128xf32, #tpu.memory_space<vmem>>, vector<4x128xf32>,
    %cst = arith.constant 0.000000e+00 : f32
    %23 = vector.broadcast %cst : f32 to vector<4x128xf32>
    %c20 = arith.constant 20 : index
    %c0_25 = arith.constant 0 : index
    %24 = vector.load %arg5[%c20, %c0_25] : memref<24x128xf32, #tpu.memory_space<vmem>>, vector<4x128xf32>
    tpu.vector_store %arg5[%c20, %c0_25], %23 {strides = array<i32>} : memref<24x128xf32, #tpu.memory_space<vmem>>, vector<4x128xf32>,
    %25 = tpu.iota {dimensions = array<i32: 0>} : vector<8x128xi32>
    %cst_26 = arith.constant 0.000000e+00 : f32
    %26 = vector.broadcast %cst_26 : f32 to vector<8x128xf32>
    %cst_27 = arith.constant 0.000000e+00 : f32
    %27 = vector.broadcast %cst_27 : f32 to vector<8x128xf32>
    %cst_28 = arith.constant 0.000000e+00 : f32
    %28 = vector.broadcast %cst_28 : f32 to vector<8x128xf32>
    %cst_29 = arith.constant 0.000000e+00 : f32
    %29 = vector.broadcast %cst_29 : f32 to vector<8x128xf32>
    %cst_30 = arith.constant 0.000000e+00 : f32
    %30 = vector.broadcast %cst_30 : f32 to vector<8x128xf32>
    %c0_i32 = arith.constant 0 : i32
    %c2_i32 = arith.constant 2 : i32
    %31 = arith.addi %c0_i32, %c2_i32 : i32
    %c1_i32 = arith.constant 1 : i32
    %32:5 = scf.for %arg6 = %c0_i32 to %31 step %c1_i32 iter_args(%arg7 = %26, %arg8 = %27, %arg9 = %28, %arg10 = %29, %arg11 = %30) -> (vector<8x128xf32>, vector<8x128xf32>, vector<8x128xf32>, vector<8x128xf32>, vector<8x128xf32>)  : i32 {
      %c8_i32 = arith.constant 8 : i32
      %129 = arith.muli %arg6, %c8_i32 : i32
      %130 = tpu.assume_multiple %129, 8 : i32
      %131 = arith.index_cast %130 : i32 to index
      %c0_63 = arith.constant 0 : index
      %132 = vector.load %arg5[%131, %c0_63] : memref<24x128xf32, #tpu.memory_space<vmem>>, vector<12x128xf32>
      %c8_i32_64 = arith.constant 8 : i32
      %133 = arith.muli %arg6, %c8_i32_64 : i32
      %c16_i32 = arith.constant 16 : i32
      %134 = arith.subi %c16_i32, %133 : i32
      %135 = vector.broadcast %134 : i32 to vector<8x128xi32>
      %136 = arith.cmpi slt, %25, %135 : vector<8x128xi32>
      %137 = vector.extract_strided_slice %132 {offsets = [0, 0], sizes = [8, 128], strides = [1, 1]} : vector<12x128xf32> to vector<8x128xf32>
      %cst_65 = arith.constant 0.000000e+00 : f32
      %138 = vector.broadcast %cst_65 : f32 to vector<8x128xf32>
      %139 = arith.select %136, %137, %138 : vector<8x128xi1>, vector<8x128xf32>
      %140 = vector.extract_strided_slice %132 {offsets = [0, 0], sizes = [8, 128], strides = [1, 1]} : vector<12x128xf32> to vector<8x128xf32>
      %141 = arith.mulf %139, %140 : vector<8x128xf32>
      %142 = arith.addf %arg7, %141 : vector<8x128xf32>
      %143 = vector.extract_strided_slice %132 {offsets = [1, 0], sizes = [8, 128], strides = [1, 1]} : vector<12x128xf32> to vector<8x128xf32>
      %144 = arith.mulf %139, %143 : vector<8x128xf32>
      %145 = arith.addf %arg8, %144 : vector<8x128xf32>
      %146 = vector.extract_strided_slice %132 {offsets = [2, 0], sizes = [8, 128], strides = [1, 1]} : vector<12x128xf32> to vector<8x128xf32>
      %147 = arith.mulf %139, %146 : vector<8x128xf32>
      %148 = arith.addf %arg9, %147 : vector<8x128xf32>
      %149 = vector.extract_strided_slice %132 {offsets = [3, 0], sizes = [8, 128], strides = [1, 1]} : vector<12x128xf32> to vector<8x128xf32>
      %150 = arith.mulf %139, %149 : vector<8x128xf32>
      %151 = arith.addf %arg10, %150 : vector<8x128xf32>
      %152 = vector.extract_strided_slice %132 {offsets = [4, 0], sizes = [8, 128], strides = [1, 1]} : vector<12x128xf32> to vector<8x128xf32>
      %153 = arith.mulf %139, %152 : vector<8x128xf32>
      %154 = arith.addf %arg11, %153 : vector<8x128xf32>
      scf.yield %142, %145, %148, %151, %154 : vector<8x128xf32>, vector<8x128xf32>, vector<8x128xf32>, vector<8x128xf32>, vector<8x128xf32>
    }
    %c2_i32_31 = arith.constant 2 : i32
    %cst_32 = arith.constant dense<0.000000e+00> : vector<128xf32>
    %33 = vector.multi_reduction <add>, %32#0, %cst_32 [0] : vector<8x128xf32> to vector<128xf32>
    %34 = vector.shape_cast %33 : vector<128xf32> to vector<1x128xf32>
    %cst_33 = arith.constant dense<0.000000e+00> : vector<128xf32>
    %35 = vector.multi_reduction <add>, %32#1, %cst_33 [0] : vector<8x128xf32> to vector<128xf32>
    %36 = vector.shape_cast %35 : vector<128xf32> to vector<1x128xf32>
    %cst_34 = arith.constant dense<0.000000e+00> : vector<128xf32>
    %37 = vector.multi_reduction <add>, %32#2, %cst_34 [0] : vector<8x128xf32> to vector<128xf32>
    %38 = vector.shape_cast %37 : vector<128xf32> to vector<1x128xf32>
    %cst_35 = arith.constant dense<0.000000e+00> : vector<128xf32>
    %39 = vector.multi_reduction <add>, %32#3, %cst_35 [0] : vector<8x128xf32> to vector<128xf32>
    %40 = vector.shape_cast %39 : vector<128xf32> to vector<1x128xf32>
    %cst_36 = arith.constant dense<0.000000e+00> : vector<128xf32>
    %41 = vector.multi_reduction <add>, %32#4, %cst_36 [0] : vector<8x128xf32> to vector<128xf32>
    %42 = vector.shape_cast %41 : vector<128xf32> to vector<1x128xf32>
    %cst_37 = arith.constant 1.000000e+00 : f32
    %43 = vector.broadcast %cst_37 : f32 to vector<1x128xf32>
    %cst_38 = arith.constant 0.000000e+00 : f32
    %44 = vector.broadcast %cst_38 : f32 to vector<1x128xf32>
    %cst_39 = arith.constant 0.000000e+00 : f32
    %45 = vector.broadcast %cst_39 : f32 to vector<1x128xf32>
    %46 = arith.subf %45, %36 : vector<1x128xf32>
    %cst_40 = arith.constant 1.000000e-07 : f32
    %47 = vector.broadcast %cst_40 : f32 to vector<1x128xf32>
    %48 = arith.maximumf %34, %47 : vector<1x128xf32>
    %49 = tpu.reciprocal %48 {approx = true} : vector<1x128xf32> -> vector<1x128xf32>
    %50 = arith.mulf %48, %49 : vector<1x128xf32>
    %cst_41 = arith.constant 2.000000e+00 : f32
    %51 = vector.broadcast %cst_41 : f32 to vector<1x128xf32>
    %52 = arith.subf %51, %50 : vector<1x128xf32>
    %53 = arith.mulf %49, %52 : vector<1x128xf32>
    %54 = arith.mulf %46, %53 : vector<1x128xf32>
    %55 = arith.mulf %36, %54 : vector<1x128xf32>
    %56 = arith.addf %34, %55 : vector<1x128xf32>
    %57 = tpu.concatenate %43, %54, %44, %44, %44, %44, %44, %44 in 0 : vector<1x128xf32>, vector<1x128xf32>, vector<1x128xf32>, vector<1x128xf32>, vector<1x128xf32>, vector<1x128xf32>, vector<1x128xf32>, vector<1x128xf32> -> vector<8x128xf32>
    %58 = tpu.concatenate %44, %54, %43, %44, %44, %44, %44, %44 in 0 : vector<1x128xf32>, vector<1x128xf32>, vector<1x128xf32>, vector<1x128xf32>, vector<1x128xf32>, vector<1x128xf32>, vector<1x128xf32>, vector<1x128xf32> -> vector<8x128xf32>
    %59 = tpu.concatenate %38, %36, %34, %44, %44, %44, %42, %40 in 0 : vector<1x128xf32>, vector<1x128xf32>, vector<1x128xf32>, vector<1x128xf32>, vector<1x128xf32>, vector<1x128xf32>, vector<1x128xf32>, vector<1x128xf32> -> vector<8x128xf32>
    %60 = arith.mulf %57, %59 : vector<8x128xf32>
    %cst_42 = arith.constant dense<0.000000e+00> : vector<128xf32>
    %61 = vector.multi_reduction <add>, %60, %cst_42 [0] : vector<8x128xf32> to vector<128xf32>
    %62 = vector.shape_cast %61 : vector<128xf32> to vector<1x128xf32>
    %cst_43 = arith.constant 0.000000e+00 : f32
    %63 = vector.broadcast %cst_43 : f32 to vector<1x128xf32>
    %64 = arith.subf %63, %62 : vector<1x128xf32>
    %cst_44 = arith.constant 1.000000e-07 : f32
    %65 = vector.broadcast %cst_44 : f32 to vector<1x128xf32>
    %66 = arith.maximumf %56, %65 : vector<1x128xf32>
    %67 = tpu.reciprocal %66 {approx = true} : vector<1x128xf32> -> vector<1x128xf32>
    %68 = arith.mulf %66, %67 : vector<1x128xf32>
    %cst_45 = arith.constant 2.000000e+00 : f32
    %69 = vector.broadcast %cst_45 : f32 to vector<1x128xf32>
    %70 = arith.subf %69, %68 : vector<1x128xf32>
    %71 = arith.mulf %67, %70 : vector<1x128xf32>
    %72 = arith.mulf %64, %71 : vector<1x128xf32>
    %73 = vector.broadcast %72 : vector<1x128xf32> to vector<8x128xf32>
    %74 = arith.mulf %73, %58 : vector<8x128xf32>
    %75 = arith.addf %57, %74 : vector<8x128xf32>
    %76 = vector.broadcast %72 : vector<1x128xf32> to vector<8x128xf32>
    %77 = arith.mulf %76, %57 : vector<8x128xf32>
    %78 = arith.addf %58, %77 : vector<8x128xf32>
    %79 = arith.mulf %72, %72 : vector<1x128xf32>
    %cst_46 = arith.constant 1.000000e+00 : f32
    %80 = vector.broadcast %cst_46 : f32 to vector<1x128xf32>
    %81 = arith.subf %80, %79 : vector<1x128xf32>
    %82 = arith.mulf %81, %56 : vector<1x128xf32>
    %c1_i32_47 = arith.constant 1 : i32
    %83 = tpu.dynamic_rotate %78 by %c1_i32_47 dim 0 : vector<8x128xf32>, i32 -> vector<8x128xf32>
    %c1_i32_48 = arith.constant 1 : i32
    %84 = tpu.dynamic_rotate %59 by %c1_i32_48 dim 0 : vector<8x128xf32>, i32 -> vector<8x128xf32>
    %85 = arith.mulf %75, %84 : vector<8x128xf32>
    %cst_49 = arith.constant dense<0.000000e+00> : vector<128xf32>
    %86 = vector.multi_reduction <add>, %85, %cst_49 [0] : vector<8x128xf32> to vector<128xf32>
    %87 = vector.shape_cast %86 : vector<128xf32> to vector<1x128xf32>
    %cst_50 = arith.constant 0.000000e+00 : f32
    %88 = vector.broadcast %cst_50 : f32 to vector<1x128xf32>
    %89 = arith.subf %88, %87 : vector<1x128xf32>
    %cst_51 = arith.constant 1.000000e-07 : f32
    %90 = vector.broadcast %cst_51 : f32 to vector<1x128xf32>
    %91 = arith.maximumf %82, %90 : vector<1x128xf32>
    %92 = tpu.reciprocal %91 {approx = true} : vector<1x128xf32> -> vector<1x128xf32>
    %93 = arith.mulf %91, %92 : vector<1x128xf32>
    %cst_52 = arith.constant 2.000000e+00 : f32
    %94 = vector.broadcast %cst_52 : f32 to vector<1x128xf32>
    %95 = arith.subf %94, %93 : vector<1x128xf32>
    %96 = arith.mulf %92, %95 : vector<1x128xf32>
    %97 = arith.mulf %89, %96 : vector<1x128xf32>
    %98 = vector.broadcast %97 : vector<1x128xf32> to vector<8x128xf32>
    %99 = arith.mulf %98, %83 : vector<8x128xf32>
    %100 = arith.addf %75, %99 : vector<8x128xf32>
    %101 = vector.broadcast %97 : vector<1x128xf32> to vector<8x128xf32>
    %102 = arith.mulf %101, %75 : vector<8x128xf32>
    %103 = arith.addf %83, %102 : vector<8x128xf32>
    %104 = arith.mulf %97, %97 : vector<1x128xf32>
    %cst_53 = arith.constant 1.000000e+00 : f32
    %105 = vector.broadcast %cst_53 : f32 to vector<1x128xf32>
    %106 = arith.subf %105, %104 : vector<1x128xf32>
    %107 = arith.mulf %106, %82 : vector<1x128xf32>
    %c1_i32_54 = arith.constant 1 : i32
    %108 = tpu.dynamic_rotate %103 by %c1_i32_54 dim 0 : vector<8x128xf32>, i32 -> vector<8x128xf32>
    %c1_i32_55 = arith.constant 1 : i32
    %109 = tpu.dynamic_rotate %84 by %c1_i32_55 dim 0 : vector<8x128xf32>, i32 -> vector<8x128xf32>
    %110 = arith.mulf %100, %109 : vector<8x128xf32>
    %cst_56 = arith.constant dense<0.000000e+00> : vector<128xf32>
    %111 = vector.multi_reduction <add>, %110, %cst_56 [0] : vector<8x128xf32> to vector<128xf32>
    %112 = vector.shape_cast %111 : vector<128xf32> to vector<1x128xf32>
    %cst_57 = arith.constant 0.000000e+00 : f32
    %113 = vector.broadcast %cst_57 : f32 to vector<1x128xf32>
    %114 = arith.subf %113, %112 : vector<1x128xf32>
    %cst_58 = arith.constant 1.000000e-07 : f32
    %115 = vector.broadcast %cst_58 : f32 to vector<1x128xf32>
    %116 = arith.maximumf %107, %115 : vector<1x128xf32>
    %117 = tpu.reciprocal %116 {approx = true} : vector<1x128xf32> -> vector<1x128xf32>
    %118 = arith.mulf %116, %117 : vector<1x128xf32>
    %cst_59 = arith.constant 2.000000e+00 : f32
    %119 = vector.broadcast %cst_59 : f32 to vector<1x128xf32>
    %120 = arith.subf %119, %118 : vector<1x128xf32>
    %121 = arith.mulf %117, %120 : vector<1x128xf32>
    %122 = arith.mulf %114, %121 : vector<1x128xf32>
    %123 = vector.broadcast %122 : vector<1x128xf32> to vector<8x128xf32>
    %124 = arith.mulf %123, %108 : vector<8x128xf32>
    %125 = arith.addf %100, %124 : vector<8x128xf32>
    %c0_60 = arith.constant 0 : index
    %c0_61 = arith.constant 0 : index
    %c0_62 = arith.constant 0 : index
    %126 = vector.load %arg4[%c0_60, %c0_61, %c0_62] : memref<1x8x128xf32, #tpu.memory_space<vmem>>, vector<1x8x128xf32>
    %127 = vector.shape_cast %126 : vector<1x8x128xf32> to vector<8x128xf32>
    %128 = vector.shape_cast %125 : vector<8x128xf32> to vector<1x8x128xf32>
    tpu.vector_store %arg4[%c0_60, %c0_61, %c0_62], %128 {strides = array<i32>} : memref<1x8x128xf32, #tpu.memory_space<vmem>>, vector<1x8x128xf32>,
    return
  }
  func.func @transform_0(%arg0: i32, %arg1: i32) -> (i32, i32, i32) {
    %c0_i32 = arith.constant 0 : i32
    %c0_i32_0 = arith.constant 0 : i32
    return %arg0, %c0_i32, %arg1 : i32, i32, i32
  }
  func.func @transform_1(%arg0: i32, %arg1: i32) -> (i32, i32, i32) {
    %c1_i32 = arith.constant 1 : i32
    %0 = arith.addi %arg1, %c1_i32 : i32
    %c1_i32_0 = arith.constant 1 : i32
    %1 = arith.muli %0, %c1_i32_0 : i32
    %c0_i32 = arith.constant 0 : i32
    %c0_i32_1 = arith.constant 0 : i32
    return %arg0, %c0_i32, %1 : i32, i32, i32
  }
  func.func @transform_2(%arg0: i32, %arg1: i32) -> (i32, i32, i32) {
    %c0_i32 = arith.constant 0 : i32
    %c0_i32_0 = arith.constant 0 : i32
    return %arg0, %c0_i32, %arg1 : i32, i32, i32
  }
}

</mosaic_0001>

<bundles_post_ra>
// kernel: linear_predictive_coding.1
= control target key start
LH: loop header
LB: loop body
LE: loop exit
PB: predicated region body
PF: predicated region fallthrough
CT: control target
= control target key end

     0   :  { %s747_s9 = smov 0   ;;  %s749_s10 = smov 0   ;;  %s830_s0 = inlined_call_operand.vmem [shape: f32[2,4,256], index: 0, kind: input, shape index: {}, may-alias: {0,1}]   ;;  %s831_s1 = inlined_call_operand.vmem [shape: f32[2,4,256], index: 1, kind: input, shape index: {}, may-alias: {0,1}]   ;;  %s832_s2 = inlined_call_operand.vmem [shape: f32[2,8,128], index: 2, kind: output, shape index: {}]  }
   0x1   :  { %s751_s11 = smov 0  }
   0x2 LB: > { %s24_s12 = sadd.s32 1, %s698_s10  ;;  %p559_p0 = scmp.ge.s32.totalorder %s702_s11, 1  ;;  %s702_s11 = sphi %s751_s11, %s12_s11   ;;  %s698_s10 = sphi %s749_s10, %s834_s10   ;;  %s694_s9 = sphi %s747_s9, %s833_s9  }
   0x3   : > { %p26_p1 = scmp.ge.s32.totalorder %s24_s12, 2  ;;  %p150_p2 = scmp.lt.s32.totalorder %s702_s11, 3 }
   0x5   : > { %s836_s12 = smov (%p26_p1, %s24_s12), 0  ;;  %p151_p3 = pnand %p559_p0, %p150_p2 }
   0x6   : > { %p186_p4 = scmp.lt.s32.totalorder (!%p151_p3), %s694_s9, 1  ;;  %v255_v0 = vlaneseq (!%p151_p3)  ;;  %v728_v1 = vmov (!%p151_p3), 0.0   ;;  %s729_s20 = smov (!%p151_p3), 126   ;;  %vm236_vm0 = vcmask (!%p151_p3), 1031168   ;;  %vm223_vm1 = vcmask (!%p151_p3), 1039360  }
   0x7   : > { %154 = sbr.rel (%p151_p3) target bundleno = 274 (0x112), region = 28  ;;  %254 = vst [vmem:[#allocation2 + $0x14] sm:$0xf] (!%p151_p3), %v728_v1  ;;  %s730_s21 = smov (!%p151_p3), 127   ;;  %vm249_vm2 = vcmask (!%p151_p3), 1022976   ;;  %v704_v20 = vmov (!%p151_p3), 0.0  }
   0x8   : > { %v765_v2 = vshrl.u32 (!%p151_p3), %v255_v0, 7  ;;  %s731_s26 = smov (!%p151_p3), 125   ;;  %v708_v21 = vmov (!%p151_p3), 0.0   ;;  %v712_v22 = vmov (!%p151_p3), 0.0   ;;  %v716_v23 = vmov (!%p151_p3), 0.0   ;;  %s781_s27 = smov (!%p151_p3), 0  }
   0x9   : > { %v720_v24 = vmov (!%p151_p3), 0.0  }
   0xe   : > { %s838_s9 = smov (!%p186_p4, %s694_s9), 1 }
   0xf   : > { %s767_s13 = sshll.u32 %s838_s9, 3 }
  0x10   : > { %s193_s16 = scalar_lea.vmem %s830_s0, %s767_s13  ;;  %s210_s19 = scalar_lea.vmem %s832_s2, %s767_s13 }
  0x11   : > { %v226_v3 = vld [vmem:[%s193_s16] sm:$0xf]  ;;  %s570_s22 = sadd.s32 4, %s767_s13 }
  0x12   : > { %v211_v4 = vld [vmem:[%s193_s16] sm:$0xf]  ;;  %229 = vrot.lane.b32.xlu1 %v226_v3, %s729_s20  ;;  %s202_s25 = scalar_lea.vmem %s831_s1, %s570_s22 }
  0x13   : > { %v213_v5 = vld [vmem:[%s193_s16] sm:$0xf]  ;;  %212 = vst [vmem:[#allocation2] sm:$0xf] %v211_v4 }
  0x14   : > { %216 = vrot.lane.b32.xlu0 %v213_v5, %s730_s21  ;;  %v227_v6 = vld [vmem:[%s202_s25] sm:$0xf] }
  0x15   : > { %v214_v7 = vld [vmem:[%s202_s25] sm:$0xf] }
  0x16   : > { %233 = vrot.lane.b32.xlu1 %v227_v6, %s729_s20  ;;  %v240_v8 = vld [vmem:[%s202_s25] sm:$0xf] }
  0x17   : > { %v239_v9 = vld [vmem:[%s193_s16] sm:$0xf] }
  0x18   : > { %220 = vrot.lane.b32.xlu0 %v214_v7, %s730_s21 }
  0x1a   : > { %v252_v10 = vld [vmem:[#allocation2] sm:$0xf]  ;;  %246 = vrot.lane.b32.xlu1 %v240_v8, %s731_s26 }
  0x1b   : > { %253 = vst [vmem:[#allocation2 + $0x10] sm:$0xf] %v252_v10 }
  0x1c   : > { %242 = vrot.lane.b32.xlu0 %v239_v9, %s731_s26 }
  0x84   : > { %v230_v11 = vpop.permute.xlu1 %229 }
  0x86   : > { %v217_v12 = vpop.permute.xlu0 %216 }
  0x88   : > { %v234_v13 = vpop.permute.xlu1 %233 }
  0x89   : > { %v237_v15 = vsel %vm236_vm0, %v230_v11, %v234_v13 }
  0x8a   : > { %v221_v14 = vpop.permute.xlu0 %220  ;;  %238 = vst [vmem:[#allocation2 + $0x8] sm:$0xf] %v237_v15 }
  0x8b   : > { %v224_v16 = vsel %vm223_vm1, %v217_v12, %v221_v14 }
  0x8c   : > { %225 = vst [vmem:[#allocation2 + $0x4] sm:$0xf] %v224_v16  ;;  %v247_v17 = vpop.permute.xlu1 %246 }
  0x8e   : > { %v243_v18 = vpop.permute.xlu0 %242 }
  0x8f   : > { %v250_v19 = vsel %vm249_vm2, %v243_v18, %v247_v17 }
  0x90   : > { %251 = vst [vmem:[#allocation2 + $0xc] sm:$0xf] %v250_v19 }
  0x91 LB: >> { %s565_s28 = sshll.u32 %s726_s27, 3  ;;  %vm280_vm3 = vcmask 1046528   ;;  %vm287_vm4 = vcmask 1045504   ;;  %vm294_vm5 = vcmask 1044480   ;;  %vm301_vm6 = vcmask 1043456   ;;  %s262_s27 = sadd.s32 1, %s726_s27   ;;  %s726_s27 = sphi %s781_s27, %s262_s27   ;;  %v722_v24 = vphi %v720_v24, %v721_v24   ;;  %v718_v23 = vphi %v716_v23, %v717_v23   ;;  %v714_v22 = vphi %v712_v22, %v713_v22   ;;  %v710_v21 = vphi %v708_v21, %v709_v21   ;;  %v706_v20 = vphi %v704_v20, %v705_v20  }
  0x92   : >> { %s272_s29 = ssub.s32 16, %s565_s28  ;;  %s269_s30 = scalar_lea.vmem [#allocation2], %s565_s28 }
  0x93   : >> { %v273_v27 = vstv %s272_s29  ;;  %p259_p5 = scmp.ge.s32.totalorder %s262_s27, 2  }
  0x94   : >> { %vm274_vm7 = vcmp.lt.s32.totalorder %v765_v2, %v273_v27  ;;  %vm347_vm8 = vcmask (%p259_p5), 1040384   ;;  %vm349_vm9 = vcmask (%p259_p5), 1041408   ;;  %vm351_vm10 = vcmask (%p259_p5), 1042432  }
  0x97   : >> { %v270_v25 = vld [vmem:[%s269_s30] sm:$0xff]  ;;  %v271_v26 = vld [vmem:[%s269_s30 + $0x8] sm:$0xf] }
  0x98   : >> { %v281_v28 = vrot.slane %v270_v25, 1  ;;  %v282_v29 = vrot.slane %v271_v26, 1  ;;  %v288_v30 = vrot.slane %v270_v25, 2  ;;  %v275_v31 = vsel %vm274_vm7, %v270_v25, 0.0 }
  0x99   : >> { %v289_v32 = vrot.slane %v271_v26, 2  ;;  %v295_v33 = vrot.slane %v270_v25, 3  ;;  %v296_v34 = vrot.slane %v271_v26, 3  ;;  %v276_v35 = vmul.f32 %v275_v31, %v270_v25 }
  0x9a   : >> { %v283_v36 = vsel %vm280_vm3, %v281_v28, %v282_v29  ;;  %v302_v37 = vrot.slane %v270_v25, 4  ;;  %v303_v38 = vrot.slane %v271_v26, 4 }
  0x9b   : >> { %v285_v39 = vmul.f32 %v283_v36, %v275_v31  ;;  %v290_v40 = vsel %vm287_vm4, %v288_v30, %v289_v32  ;;  %v297_v41 = vsel %vm294_vm5, %v295_v33, %v296_v34  ;;  %v277_v42 = vadd.f32 %v722_v24, %v276_v35   ;;  %261 = sbr.rel (!%p259_p5) target bundleno = 145 (0x91), region = 69 }
  0x9c   : >> { %v292_v43 = vmul.f32 %v290_v40, %v275_v31  ;;  %v299_v44 = vmul.f32 %v297_v41, %v275_v31  ;;  %v304_v45 = vsel %vm301_vm6, %v302_v37, %v303_v38 }
  0x9d   : >> { %v286_v46 = vadd.f32 %v718_v23, %v285_v39   ;;  %v306_v47 = vmul.f32 %v304_v45, %v275_v31  ;;  %v721_v24 = vmov %v277_v42   ;;  %v308_v51 = vrot.slane (%p259_p5), %v277_v42, 4 }
  0x9e   : >> { %v293_v48 = vadd.f32 %v714_v22, %v292_v43   ;;  %v300_v49 = vadd.f32 %v710_v21, %v299_v44  }
  0x9f   : >> { %v307_v50 = vadd.f32 %v706_v20, %v306_v47   ;;  %v717_v23 = vmov %v286_v46   ;;  %v314_v52 = vrot.slane (%p259_p5), %v286_v46, 4  ;;  %v309_v54 = vadd.f32 (%p259_p5), %v308_v51, %v277_v42 }
  0xa0   : >> { %v709_v21 = vmov %v300_v49   ;;  %v713_v22 = vmov %v293_v48   ;;  %v320_v53 = vrot.slane (%p259_p5), %v293_v48, 4  ;;  %v326_v6 = vrot.slane (%p259_p5), %v300_v49, 4 }
  0xa1   : >> { %v705_v20 = vmov %v307_v50   ;;  %v315_v55 = vadd.f32 (%p259_p5), %v314_v52, %v286_v46  ;;  %v310_v57 = vrot.slane (%p259_p5), %v309_v54, 2  ;;  %v332_v1 = vrot.slane (%p259_p5), %v307_v50, 4 }
  0xa2   : > { %v321_v56 = vadd.f32 %v320_v53, %v293_v48  ;;  %v327_v9 = vadd.f32 %v326_v6, %v300_v49 }
  0xa3   : > { %v316_v59 = vrot.slane %v315_v55, 2  ;;  %v311_v60 = vadd.f32 %v310_v57, %v309_v54  ;;  %v333_v7 = vadd.f32 %v332_v1, %v307_v50 }
  0xa4   : > { %v322_v58 = vrot.slane %v321_v56, 2  ;;  %v328_v12 = vrot.slane %v327_v9, 2 }
  0xa5   : > { %v312_v62 = vrot.slane %v311_v60, 1  ;;  %v317_v63 = vadd.f32 %v316_v59, %v315_v55  ;;  %v334_v10 = vrot.slane %v333_v7, 2 }
  0xa6   : > { %v323_v61 = vadd.f32 %v322_v58, %v321_v56  ;;  %v329_v16 = vadd.f32 %v328_v12, %v327_v9 }
  0xa7   : > { %v313_v0 = vadd.f32 %v312_v62, %v311_v60  ;;  %v318_v5 = vrot.slane %v317_v63, 1  ;;  %v335_v13 = vadd.f32 %v334_v10, %v333_v7 }
  0xa8   : > { %v324_v3 = vrot.slane %v323_v61, 1  ;;  %v330_v23 = vrot.slane %v329_v16, 1 }
  0xa9   : > { %v339_v4 = vmax.f32 %v313_v0, 1e-07  ;;  %v319_v8 = vadd.f32 %v318_v5, %v317_v63  ;;  %v336_v19 = vrot.slane %v335_v13, 1 }
  0xaa   : > { %v325_v2 = vadd.f32 %v324_v3, %v323_v61  ;;  %v331_v28 = vadd.f32 %v330_v23, %v329_v16 }
  0xab   : > { %648 = vrcp.f32 %v339_v4  ;;  %v338_v20 = vsub.f32 0.0, %v319_v8  ;;  %v337_v25 = vadd.f32 %v336_v19, %v335_v13 }
  0xac   : > { %v368_v11 = vsel %vm347_vm8, %v325_v2, %v319_v8 }
  0xad   : > { %v369_v14 = vsel %vm349_vm9, %v368_v11, %v313_v0 }
  0xae   : > { %v370_v18 = vsel %vm351_vm10, %v369_v14, 0.0 }
  0xaf   : > { %v371_v22 = vsel %vm301_vm6, %v370_v18, 0.0 }
  0xb0   : > { %v372_v27 = vsel %vm294_vm5, %v371_v22, 0.0 }
  0xb1   : > { %v373_v32 = vsel %vm287_vm4, %v372_v27, %v337_v25 }
  0xb2   : > { %v374_v38 = vsel %vm280_vm3, %v373_v32, %v331_v28 }
  0xb3   : > { %v397_v63 = vrot.slane %v374_v38, 7 }
  0xb5   : > { %v649_v15 = vpop.eup %648  ;;  %v420_v22 = vrot.slane %v397_v63, 7 }
  0xb6   : > { %v341_v17 = vmul.f32 %v649_v15, %v339_v4 }
  0xb8   : > { %v342_v21 = vsub.f32 2.0, %v341_v17 }
  0xba   : > { %v343_v24 = vmul.f32 %v649_v15, %v342_v21 }
  0xbc   : > { %v344_v26 = vmul.f32 %v343_v24, %v338_v20 }
  0xbe   : > { %v345_v29 = vmul.f32 %v344_v26, %v319_v8  ;;  %v348_v30 = vsel %vm347_vm8, 1.0, %v344_v26  ;;  %v361_v37 = vsel %vm347_vm8, 0.0, %v344_v26 }
  0xbf   : > { %v350_v31 = vsel %vm349_vm9, %v348_v30, 0.0  ;;  %v362_v42 = vsel %vm349_vm9, %v361_v37, 1.0 }
  0xc0   : > { %v346_v33 = vadd.f32 %v345_v29, %v313_v0  ;;  %v352_v34 = vsel %vm351_vm10, %v350_v31, 0.0  ;;  %v363_v45 = vsel %vm351_vm10, %v362_v42, 0.0 }
  0xc1   : > { %v354_v35 = vsel %vm301_vm6, %v352_v34, 0.0  ;;  %v364_v47 = vsel %vm301_vm6, %v363_v45, 0.0 }
  0xc2   : > { %v356_v36 = vsel %vm294_vm5, %v354_v35, 0.0  ;;  %v383_v39 = vmax.f32 %v346_v33, 1e-07  ;;  %v365_v51 = vsel %vm294_vm5, %v364_v47, 0.0 }
  0xc3   : > { %v358_v40 = vsel %vm287_vm4, %v356_v36, 0.0  ;;  %v366_v54 = vsel %vm287_vm4, %v365_v51, 0.0 }
  0xc4   : > { %v360_v41 = vsel %vm280_vm3, %v358_v40, 0.0  ;;  %650 = vrcp.f32 %v383_v39  ;;  %v367_v59 = vsel %vm280_vm3, %v366_v54, 0.0 }
  0xc5   : > { %v375_v43 = vmul.f32 %v374_v38, %v360_v41 }
  0xc7   : > { %v376_v44 = vrot.slane %v375_v43, 4 }
  0xc9   : > { %v377_v46 = vadd.f32 %v376_v44, %v375_v43 }
  0xcb   : > { %v378_v48 = vrot.slane %v377_v46, 2 }
  0xcd   : > { %v379_v49 = vadd.f32 %v378_v48, %v377_v46 }
  0xce   : > { %v651_v50 = vpop.eup %650 }
  0xcf   : > { %v380_v52 = vrot.slane %v379_v49, 1  ;;  %v385_v53 = vmul.f32 %v651_v50, %v383_v39 }
  0xd1   : > { %v381_v55 = vadd.f32 %v380_v52, %v379_v49  ;;  %v386_v56 = vsub.f32 2.0, %v385_v53 }
  0xd3   : > { %v382_v57 = vsub.f32 0.0, %v381_v55  ;;  %v387_v58 = vmul.f32 %v651_v50, %v386_v56 }
  0xd5   : > { %v388_v60 = vmul.f32 %v387_v58, %v382_v57 }
  0xd7   : > { %v389_v61 = vmul.f32 %v388_v60, %v367_v59  ;;  %v393_v62 = vmul.f32 %v388_v60, %v388_v60  ;;  %v391_v10 = vmul.f32 %v388_v60, %v360_v41 }
  0xd9   : > { %v390_v0 = vadd.f32 %v389_v61, %v360_v41  ;;  %v394_v1 = vsub.f32 1.0, %v393_v62  ;;  %v392_v13 = vadd.f32 %v391_v10, %v367_v59 }
  0xdb   : > { %v395_v3 = vmul.f32 %v394_v1, %v346_v33  ;;  %v398_v4 = vmul.f32 %v397_v63, %v390_v0  ;;  %v396_v17 = vrot.slane %v392_v13, 7 }
  0xdd   : > { %v399_v5 = vrot.slane %v398_v4, 4  ;;  %v406_v6 = vmax.f32 %v395_v3, 1e-07 }
  0xdf   : > { %v400_v7 = vadd.f32 %v399_v5, %v398_v4  ;;  %652 = vrcp.f32 %v406_v6 }
  0xe1   : > { %v401_v2 = vrot.slane %v400_v7, 2 }
  0xe3   : > { %v402_v8 = vadd.f32 %v401_v2, %v400_v7 }
  0xe5   : > { %v403_v9 = vrot.slane %v402_v8, 1 }
  0xe7   : > { %v404_v11 = vadd.f32 %v403_v9, %v402_v8 }
  0xe9   : > { %v653_v12 = vpop.eup %652  ;;  %v405_v15 = vsub.f32 0.0, %v404_v11 }
  0xea   : > { %v408_v14 = vmul.f32 %v653_v12, %v406_v6 }
  0xec   : > { %v409_v16 = vsub.f32 2.0, %v408_v14 }
  0xee   : > { %v410_v18 = vmul.f32 %v653_v12, %v409_v16 }
  0xf0   : > { %v411_v19 = vmul.f32 %v410_v18, %v405_v15 }
  0xf2   : > { %v412_v20 = vmul.f32 %v411_v19, %v396_v17  ;;  %v416_v21 = vmul.f32 %v411_v19, %v411_v19  ;;  %v414_v33 = vmul.f32 %v411_v19, %v390_v0 }
  0xf4   : > { %v413_v23 = vadd.f32 %v412_v20, %v390_v0  ;;  %v417_v24 = vsub.f32 1.0, %v416_v21  ;;  %v415_v36 = vadd.f32 %v414_v33, %v396_v17 }
  0xf6   : > { %v418_v25 = vmul.f32 %v417_v24, %v395_v3  ;;  %v421_v26 = vmul.f32 %v420_v22, %v413_v23  ;;  %v419_v40 = vrot.slane %v415_v36, 7 }
  0xf8   : > { %v422_v27 = vrot.slane %v421_v26, 4  ;;  %v429_v28 = vmax.f32 %v418_v25, 1e-07 }
  0xfa   : > { %v423_v29 = vadd.f32 %v422_v27, %v421_v26  ;;  %654 = vrcp.f32 %v429_v28 }
  0xfc   : > { %v424_v30 = vrot.slane %v423_v29, 2 }
  0xfe   : > { %v425_v31 = vadd.f32 %v424_v30, %v423_v29 }
 0x100   : > { %v426_v32 = vrot.slane %v425_v31, 1 }
 0x102   : > { %v427_v34 = vadd.f32 %v426_v32, %v425_v31 }
 0x104   : > { %v655_v35 = vpop.eup %654  ;;  %v428_v38 = vsub.f32 0.0, %v427_v34 }
 0x105   : > { %v431_v37 = vmul.f32 %v655_v35, %v429_v28 }
 0x107   : > { %v432_v39 = vsub.f32 2.0, %v431_v37 }
 0x109   : > { %v433_v41 = vmul.f32 %v655_v35, %v432_v39 }
 0x10b   : > { %v434_v42 = vmul.f32 %v433_v41, %v428_v38 }
 0x10d   : > { %v435_v43 = vmul.f32 %v434_v42, %v419_v40 }
 0x10f   : > { %v436_v44 = vadd.f32 %v435_v43, %v413_v23 }
 0x111   : > { %437 = vst [vmem:[%s210_s19] sm:$0xff] %v436_v44 }
 0x112 PF: > { %s12_s11 = sadd.s32 1, %s702_s11   ;;  %s833_s9 = smov %s698_s10 }
 0x113   : > { %p9_p6 = scmp.ge.s32.totalorder %s12_s11, 4   ;;  %s834_s10 = smov %s836_s12 }
 0x115   :  { %11 = sbr.rel (!%p9_p6) target bundleno = 2 (0x2), region = 80 }

</bundles_post_ra>
